<compile_context>
chip_gen: v5e
topology: v5e:2x2
jax: 0.10.0
libtpu: 0.0.40
codegen_flags: <defaults>
</compile_context>

<pallas_src>
import functools

import jax
import jax.numpy as jnp
import numpy as np
from jax.experimental import pallas as pl
from jax.experimental.pallas import tpu as pltpu


def decoder_kernel(x_ref, dec_ref, enc_ref, h0_ref, embt_ref,
                   wih_ref, whh_ref, bih_ref, bhh_ref,
                   wgw_ref, wgh_ref, wgc_ref, wgb_ref,
                   out_ref,
                   h_scr, w_scr,
                   *, H, V, S, B):
    j = pl.program_id(0)   # slot index
    k = pl.program_id(1)   # decode step

    # ---- one-time init (very first grid step): GRU hidden carry.
    @pl.when(jnp.logical_and(j == 0, k == 0))
    def _():
        h_scr[...] = h0_ref[...]

    # ---- per-slot init: w = decoder_input[:, j]  (dropout == identity, eval).
    @pl.when(k == 0)
    def _():
        w_scr[...] = dec_ref[...]                                      # [B, H]

    w = w_scr[...]                                                     # [B, H]
    h = h_scr[...]                                                     # [B, H]
    enc = enc_ref[...]                                                 # [B, S, H]
    x_ids = x_ref[...]                                                 # [B, S]
    mask = (x_ids == 0)                                                # [B, S]

    # ---- single-step GRU: two exact MXU matmuls (PyTorch gate order r, z, n).
    gi = jnp.dot(w, wih_ref[...], preferred_element_type=jnp.float32) + bih_ref[...]
    gh = jnp.dot(h, whh_ref[...], preferred_element_type=jnp.float32) + bhh_ref[...]
    r = jax.nn.sigmoid(gi[:, 0:H] + gh[:, 0:H])
    z = jax.nn.sigmoid(gi[:, H:2 * H] + gh[:, H:2 * H])
    n = jnp.tanh(gi[:, 2 * H:3 * H] + r * gh[:, 2 * H:3 * H])
    h_new = (1.0 - z) * n + z * h                                      # [B, H]
    h_scr[...] = h_new

    # ---- attention over encoder tokens (batched matmuls, query length 1).
    h3 = h_new[:, None, :]                                             # [B, 1, H]
    s3 = jnp.einsum('bqh,bsh->bqs', h3, enc,
                    preferred_element_type=jnp.float32)                # [B, 1, S]
    s3 = jnp.where(mask[:, None, :], -1000000000.0, s3)
    a3 = jax.nn.softmax(s3, axis=-1)                                   # [B, 1, S]

    # context vector (unit q-dim removed via a trivial reduce).
    context = jnp.sum(
        jnp.einsum('bqs,bsh->bqh', a3, enc,
                   preferred_element_type=jnp.float32), axis=1)        # [B, H]

    # copy distribution: scatter_add_(1, x, attn_history) == attn @ onehot(x);
    # one-hot built on the fly each step (no persistent O(B*S*V) scratch).
    # TODO(synk): stream per V-tile / SMEM scalar scatter at production vocab.
    onehot = (x_ids[:, :, None] ==
              jax.lax.broadcasted_iota(jnp.int32, (B, S, V), 2)).astype(jnp.float32)
    p_context_ptr = jnp.sum(
        jnp.einsum('bqs,bsv->bqv', a3, onehot,
                   preferred_element_type=jnp.float32), axis=1)        # [B, V]

    # ---- attention over vocabulary (resident transposed table [H, V]).
    attn_vocab = jax.nn.softmax(
        jnp.dot(h_new, embt_ref[...], preferred_element_type=jnp.float32),
        axis=-1)                                                       # [B, V]

    # ---- pointer / generator gate (w_gen split into three [1, H] row dots).
    p_gen = jax.nn.sigmoid(
        jnp.sum(w * wgw_ref[...], axis=-1, keepdims=True)
        + jnp.sum(h_new * wgh_ref[...], axis=-1, keepdims=True)
        + jnp.sum(context * wgc_ref[...], axis=-1, keepdims=True)
        + wgb_ref[...])                                                # [B, 1]

    p_final = p_gen * attn_vocab + (1.0 - p_gen) * p_context_ptr       # [B, V]

    # ---- greedy next-token embedding, gathered from the resident [H, V] table.
    # TODO(synk): at production sizes DMA-gather B rows of the HBM embedding.
    w_idx = jnp.argmax(p_final, axis=-1)                               # [B]
    idx_oh = (jax.lax.broadcasted_iota(jnp.int32, (B, V), 1)
              == w_idx[:, None]).astype(jnp.float32)                   # [B, V]
    w_scr[...] = jnp.dot(idx_oh, embt_ref[...].T,
                         preferred_element_type=jnp.float32)           # [B, H]

    # ---- write step k into the per-slot resident output block (module layout).
    out_ref[:, pl.ds(k, 1), :] = p_final[:, None, :]


def _resident_spec(block_shape, index_map):
    """BlockSpec for a grid-invariant input: request single buffering (the
    default double-buffering only duplicates residency for constant blocks)."""
    try:
        return pl.BlockSpec(block_shape, index_map, pipeline_mode=pl.Buffered(1))
    except (TypeError, AttributeError):   # fallback if pipeline_mode unavailable
        return pl.BlockSpec(block_shape, index_map)


def decoder_forward(x, decoder_input, encoder_output, hidden, params, max_len):
    B, S = x.shape
    _, n_update, H = decoder_input.shape
    V = params["embed"].shape[0]

    emb_t = jnp.transpose(params["embed"])                   # [H, V]
    wih, whh = params["w_ih"], params["w_hh"]                # [H, 3H] each
    bih, bhh = params["b_ih"], params["b_hh"]                # [1, 3H] each
    wgw = params["wgen_w"]                                   # [1, 3H]
    wg_w, wg_h, wg_c = wgw[:, :H], wgw[:, H:2 * H], wgw[:, 2 * H:]
    wgb = params["wgen_b"]                                   # [1, 1]

    dec_in_t = jnp.transpose(decoder_input, (1, 0, 2))       # [n_update, B, H]
    h0 = hidden[0]                                           # [B, H]

    # Explicit VMEM budget: single-buffered invariants + double-buffered blocks.
    f32 = 4
    resident_bytes = (
        B * S * 4 + B * S * H * f32 + B * H * f32 + H * V * f32
        + 2 * H * 3 * H * f32 + 2 * 3 * H * f32 + 3 * H * f32 + f32
        + 2 * B * H * f32                       # decoder_input block (2-buf)
        + 2 * B * max_len * V * f32             # per-slot output block (2-buf)
        + 2 * B * H * f32)                      # scratch carries
    vmem_limit = int(min(max(2 * resident_bytes + (4 << 20), 16 << 20), 64 << 20))

    kernel = functools.partial(decoder_kernel, H=H, V=V, S=S, B=B)

    out = pl.pallas_call(
        kernel,
        out_shape=jax.ShapeDtypeStruct((B, n_update, max_len, V), jnp.float32),
        grid_spec=pltpu.PrefetchScalarGridSpec(
            num_scalar_prefetch=0,
            grid=(n_update, max_len),
            in_specs=[
                _resident_spec((B, S), lambda j, k: (0, 0)),            # x ids
                pl.BlockSpec((None, B, H), lambda j, k: (j, 0, 0)),     # decoder_input[:, j]
                _resident_spec((B, S, H), lambda j, k: (0, 0, 0)),      # encoder_output
                _resident_spec((B, H), lambda j, k: (0, 0)),            # hidden init
                _resident_spec((H, V), lambda j, k: (0, 0)),            # embedding E^T
                _resident_spec((H, 3 * H), lambda j, k: (0, 0)),        # GRU W_ih^T
                _resident_spec((H, 3 * H), lambda j, k: (0, 0)),        # GRU W_hh^T
                _resident_spec((1, 3 * H), lambda j, k: (0, 0)),        # GRU b_ih
                _resident_spec((1, 3 * H), lambda j, k: (0, 0)),        # GRU b_hh
                _resident_spec((1, H), lambda j, k: (0, 0)),            # w_gen (w part)
                _resident_spec((1, H), lambda j, k: (0, 0)),            # w_gen (h part)
                _resident_spec((1, H), lambda j, k: (0, 0)),            # w_gen (ctx part)
                _resident_spec((1, 1), lambda j, k: (0, 0)),            # w_gen bias
            ],
            out_specs=pl.BlockSpec((B, None, max_len, V),
                                   lambda j, k: (0, j, 0, 0)),
            scratch_shapes=[
                pltpu.VMEM((B, H), jnp.float32),    # GRU hidden carry
                pltpu.VMEM((B, H), jnp.float32),    # current input token embedding
            ],
        ),
        compiler_params=pltpu.CompilerParams(
            dimension_semantics=("arbitrary", "arbitrary"),
            vmem_limit_bytes=vmem_limit),
    )(
        x.astype(jnp.int32), dec_in_t, encoder_output, h0,
        emb_t, wih, whh, bih, bhh, wg_w, wg_h, wg_c, wgb,
    )
    return out   # already in the module's (B, n_update, max_len, V) layout


def decoder_reference(x, decoder_input, encoder_output, hidden, params, max_len):
    """Pure-JAX mirror of the PyTorch forward (greedy, eval mode)."""
    emb = params["embed"]
    wih, whh = params["w_ih"], params["w_hh"]
    bih, bhh = params["b_ih"], params["b_hh"]
    wgw, wgb = params["wgen_w"], params["wgen_b"]
    B, S = x.shape
    n_update = decoder_input.shape[1]
    V, H = emb.shape
    mask = (x == 0)
    h = hidden[0]
    slot_outs = []
    for j in range(n_update):
        w = decoder_input[:, j]
        step_outs = []
        for _ in range(max_len):
            gi = w @ wih + bih
            gh = h @ whh + bhh
            r = jax.nn.sigmoid(gi[:, :H] + gh[:, :H])
            z = jax.nn.sigmoid(gi[:, H:2 * H] + gh[:, H:2 * H])
            n = jnp.tanh(gi[:, 2 * H:] + r * gh[:, 2 * H:])
            h = (1.0 - z) * n + z * h
            attn_e = jnp.einsum("bsh,bh->bs", encoder_output, h)
            attn_e = jnp.where(mask, -1000000000.0, attn_e)
            attn_history = jax.nn.softmax(attn_e, axis=-1)
            attn_vocab = jax.nn.softmax(h @ emb.T, axis=-1)
            context = jnp.einsum("bs,bsh->bh", attn_history, encoder_output)
            cat = jnp.concatenate([w, h, context], axis=-1)
            p_gen = jax.nn.sigmoid(jnp.sum(cat * wgw, -1, keepdims=True) + wgb)
            p_ctx = jnp.zeros((B, V), jnp.float32).at[
                jnp.arange(B)[:, None], x].add(attn_history)
            p_final = p_gen * attn_vocab + (1.0 - p_gen) * p_ctx
            w_idx = jnp.argmax(p_final, axis=-1)
            w = emb[w_idx]
            step_outs.append(p_final)
        slot_outs.append(jnp.stack(step_outs, axis=1))        # [B, max_len, V]
    return jnp.stack(slot_outs, axis=1)                       # [B, n_update, max_len, V]


if __name__ == "__main__":
    B, S, H, V = 2, 8, 32, 64
    n_update, max_len = 3, 4

    key = jax.random.PRNGKey(0)
    ks = jax.random.split(key, 10)

    # deterministic synthetic parameters
    embed = jax.random.normal(ks[0], (V, H), jnp.float32) * 0.5
    embed = embed.at[0].set(0.0)                               # padding_idx = 0
    params = {
        "embed": embed,
        # GRU weights stored transposed ([in, 3H]) relative to PyTorch's [3H, in]
        "w_ih": jax.random.normal(ks[1], (H, 3 * H), jnp.float32) * 0.02,
        "w_hh": jax.random.normal(ks[2], (H, 3 * H), jnp.float32) * 0.02,
        "b_ih": jax.random.normal(ks[3], (1, 3 * H), jnp.float32) * 0.02,
        "b_hh": jax.random.normal(ks[4], (1, 3 * H), jnp.float32) * 0.02,
        "wgen_w": jax.random.normal(ks[5], (1, 3 * H), jnp.float32) * 0.1,
        "wgen_b": jnp.zeros((1, 1), jnp.float32),
    }

    # inputs
    x = jax.random.randint(ks[6], (B, S), 1, V).astype(jnp.int32)
    x = x.at[:, -2:].set(0)                                    # trailing pad tokens
    decoder_input = jax.random.normal(ks[7], (B, n_update, H), jnp.float32)
    encoder_output = jax.random.normal(ks[8], (B, S, H), jnp.float32)
    hidden = jax.random.normal(ks[9], (1, B, H), jnp.float32)

    out = decoder_forward(x, decoder_input, encoder_output, hidden, params, max_len)
    out = jax.block_until_ready(out)

    ref = decoder_reference(x, decoder_input, encoder_output, hidden, params, max_len)
    ref = jax.block_until_ready(ref)

    assert out.shape == (B, n_update, max_len, V)
    np.testing.assert_allclose(np.asarray(out), np.asarray(ref), rtol=2e-2, atol=2e-3)
    print("KERNEL_OK")
</pallas_src>

<mosaic_0001>
module attributes {stable_mosaic.version = 11 : i64} {
  func.func @decoder_kernel(%arg0: i32, %arg1: i32, %arg2: memref<2x8xi32, #tpu.memory_space<vmem>>, %arg3: memref<1x2x32xf32, #tpu.memory_space<vmem>>, %arg4: memref<2x8x32xf32, #tpu.memory_space<vmem>>, %arg5: memref<2x32xf32, #tpu.memory_space<vmem>>, %arg6: memref<32x64xf32, #tpu.memory_space<vmem>>, %arg7: memref<32x96xf32, #tpu.memory_space<vmem>>, %arg8: memref<32x96xf32, #tpu.memory_space<vmem>>, %arg9: memref<1x96xf32, #tpu.memory_space<vmem>>, %arg10: memref<1x96xf32, #tpu.memory_space<vmem>>, %arg11: memref<1x32xf32, #tpu.memory_space<vmem>>, %arg12: memref<1x32xf32, #tpu.memory_space<vmem>>, %arg13: memref<1x32xf32, #tpu.memory_space<vmem>>, %arg14: memref<1x1xf32, #tpu.memory_space<vmem>>, %arg15: memref<2x1x4x64xf32, #tpu.memory_space<vmem>>, %arg16: memref<2x32xf32, #tpu.memory_space<vmem>>, %arg17: memref<2x32xf32, #tpu.memory_space<vmem>>) attributes {dimension_semantics = [#tpu.dimension_semantics<arbitrary>, #tpu.dimension_semantics<arbitrary>], iteration_bounds = array<i64: 3, 4>, scalar_prefetch = 0 : i64, scratch_operands = 2 : i64, tpu.core_type = #tpu.core_type<tc>, window_params = [{pipeline_mode = #tpu.pipeline_mode<synchronous>, transform_indices = @transform_0, window_bounds = array<i64: 2, 8>}, {transform_indices = @transform_1, window_bounds = array<i64: 1, 2, 32>}, {pipeline_mode = #tpu.pipeline_mode<synchronous>, transform_indices = @transform_2, window_bounds = array<i64: 2, 8, 32>}, {pipeline_mode = #tpu.pipeline_mode<synchronous>, transform_indices = @transform_3, window_bounds = array<i64: 2, 32>}, {pipeline_mode = #tpu.pipeline_mode<synchronous>, transform_indices = @transform_4, window_bounds = array<i64: 32, 64>}, {pipeline_mode = #tpu.pipeline_mode<synchronous>, transform_indices = @transform_5, window_bounds = array<i64: 32, 96>}, {pipeline_mode = #tpu.pipeline_mode<synchronous>, transform_indices = @transform_6, window_bounds = array<i64: 32, 96>}, {pipeline_mode = #tpu.pipeline_mode<synchronous>, transform_indices = @transform_7, window_bounds = array<i64: 1, 96>}, {pipeline_mode = #tpu.pipeline_mode<synchronous>, transform_indices = @transform_8, window_bounds = array<i64: 1, 96>}, {pipeline_mode = #tpu.pipeline_mode<synchronous>, transform_indices = @transform_9, window_bounds = array<i64: 1, 32>}, {pipeline_mode = #tpu.pipeline_mode<synchronous>, transform_indices = @transform_10, window_bounds = array<i64: 1, 32>}, {pipeline_mode = #tpu.pipeline_mode<synchronous>, transform_indices = @transform_11, window_bounds = array<i64: 1, 32>}, {pipeline_mode = #tpu.pipeline_mode<synchronous>, transform_indices = @transform_12, window_bounds = array<i64: 1, 1>}, {transform_indices = @transform_13, window_bounds = array<i64: 2, 1, 4, 64>}]} {
    %c0_i32 = arith.constant 0 : i32
    %0 = arith.cmpi eq, %arg0, %c0_i32 : i32
    %c0_i32_0 = arith.constant 0 : i32
    %1 = arith.cmpi eq, %arg1, %c0_i32_0 : i32
    %2 = arith.andi %0, %1 : i1
    %3 = arith.extui %2 : i1 to i32
    %c0_i32_1 = arith.constant 0 : i32
    %4 = arith.cmpi ne, %3, %c0_i32_1 : i32
    scf.if %4 {
      %c0_63 = arith.constant 0 : index
      %c0_64 = arith.constant 0 : index
      %138 = vector.load %arg5[%c0_63, %c0_64] : memref<2x32xf32, #tpu.memory_space<vmem>>, vector<2x32xf32>
      %c0_65 = arith.constant 0 : index
      %c0_66 = arith.constant 0 : index
      %139 = vector.load %arg16[%c0_65, %c0_66] : memref<2x32xf32, #tpu.memory_space<vmem>>, vector<2x32xf32>
      tpu.vector_store %arg16[%c0_65, %c0_66], %138 {strides = array<i32>} : memref<2x32xf32, #tpu.memory_space<vmem>>, vector<2x32xf32>,
    } else {
    }
    %c0_i32_2 = arith.constant 0 : i32
    %5 = arith.cmpi eq, %arg1, %c0_i32_2 : i32
    %6 = arith.extui %5 : i1 to i32
    %c0_i32_3 = arith.constant 0 : i32
    %7 = arith.cmpi ne, %6, %c0_i32_3 : i32
    scf.if %7 {
      %c0_63 = arith.constant 0 : index
      %c0_64 = arith.constant 0 : index
      %c0_65 = arith.constant 0 : index
      %138 = vector.load %arg3[%c0_63, %c0_64, %c0_65] : memref<1x2x32xf32, #tpu.memory_space<vmem>>, vector<1x2x32xf32>
      %139 = vector.shape_cast %138 : vector<1x2x32xf32> to vector<2x32xf32>
      %c0_66 = arith.constant 0 : index
      %c0_67 = arith.constant 0 : index
      %140 = vector.load %arg17[%c0_66, %c0_67] : memref<2x32xf32, #tpu.memory_space<vmem>>, vector<2x32xf32>
      tpu.vector_store %arg17[%c0_66, %c0_67], %139 {strides = array<i32>} : memref<2x32xf32, #tpu.memory_space<vmem>>, vector<2x32xf32>,
    } else {
    }
    %c0 = arith.constant 0 : index
    %c0_4 = arith.constant 0 : index
    %8 = vector.load %arg17[%c0, %c0_4] : memref<2x32xf32, #tpu.memory_space<vmem>>, vector<2x32xf32>
    %c0_5 = arith.constant 0 : index
    %c0_6 = arith.constant 0 : index
    %9 = vector.load %arg16[%c0_5, %c0_6] : memref<2x32xf32, #tpu.memory_space<vmem>>, vector<2x32xf32>
    %c0_7 = arith.constant 0 : index
    %c0_8 = arith.constant 0 : index
    %c0_9 = arith.constant 0 : index
    %10 = vector.load %arg4[%c0_7, %c0_8, %c0_9] : memref<2x8x32xf32, #tpu.memory_space<vmem>>, vector<2x8x32xf32>
    %c0_10 = arith.constant 0 : index
    %c0_11 = arith.constant 0 : index
    %11 = vector.load %arg2[%c0_10, %c0_11] : memref<2x8xi32, #tpu.memory_space<vmem>>, vector<2x8xi32>
    %c0_i32_12 = arith.constant 0 : i32
    %12 = vector.broadcast %c0_i32_12 : i32 to vector<2x8xi32>
    %13 = arith.cmpi eq, %11, %12 : vector<2x8xi32>
    %c0_13 = arith.constant 0 : index
    %c0_14 = arith.constant 0 : index
    %14 = vector.load %arg7[%c0_13, %c0_14] : memref<32x96xf32, #tpu.memory_space<vmem>>, vector<32x96xf32>
    %cst = arith.constant dense<0.000000e+00> : vector<2x96xf32>
    %15 = tpu.matmul %8, %14, %cst {dimension_numbers = #tpu.dot_dimension_numbers<[1], [0], [0], [1], [0, 0, 1, 1], [], []>} : vector<2x32xf32>, vector<32x96xf32>, vector<2x96xf32> -> vector<2x96xf32>
    %c0_15 = arith.constant 0 : index
    %c0_16 = arith.constant 0 : index
    %16 = vector.load %arg9[%c0_15, %c0_16] : memref<1x96xf32, #tpu.memory_space<vmem>>, vector<1x96xf32>
    %17 = vector.broadcast %16 : vector<1x96xf32> to vector<2x96xf32>
    %18 = arith.addf %15, %17 : vector<2x96xf32>
    %c0_17 = arith.constant 0 : index
    %c0_18 = arith.constant 0 : index
    %19 = vector.load %arg8[%c0_17, %c0_18] : memref<32x96xf32, #tpu.memory_space<vmem>>, vector<32x96xf32>
    %cst_19 = arith.constant dense<0.000000e+00> : vector<2x96xf32>
    %20 = tpu.matmul %9, %19, %cst_19 {dimension_numbers = #tpu.dot_dimension_numbers<[1], [0], [0], [1], [0, 0, 1, 1], [], []>} : vector<2x32xf32>, vector<32x96xf32>, vector<2x96xf32> -> vector<2x96xf32>
    %c0_20 = arith.constant 0 : index
    %c0_21 = arith.constant 0 : index
    %21 = vector.load %arg10[%c0_20, %c0_21] : memref<1x96xf32, #tpu.memory_space<vmem>>, vector<1x96xf32>
    %22 = vector.broadcast %21 : vector<1x96xf32> to vector<2x96xf32>
    %23 = arith.addf %20, %22 : vector<2x96xf32>
    %24 = vector.extract_strided_slice %18 {offsets = [0, 0], sizes = [2, 32], strides = [1, 1]} : vector<2x96xf32> to vector<2x32xf32>
    %25 = vector.extract_strided_slice %23 {offsets = [0, 0], sizes = [2, 32], strides = [1, 1]} : vector<2x96xf32> to vector<2x32xf32>
    %26 = arith.addf %24, %25 : vector<2x32xf32>
    %27 = arith.negf %26 : vector<2x32xf32>
    %28 = math.exp %27 : vector<2x32xf32>
    %cst_22 = arith.constant 1.000000e+00 : f32
    %29 = vector.broadcast %cst_22 : f32 to vector<2x32xf32>
    %30 = arith.addf %29, %28 : vector<2x32xf32>
    %31 = arith.divf %29, %30 : vector<2x32xf32>
    %32 = vector.extract_strided_slice %18 {offsets = [0, 32], sizes = [2, 32], strides = [1, 1]} : vector<2x96xf32> to vector<2x32xf32>
    %33 = vector.extract_strided_slice %23 {offsets = [0, 32], sizes = [2, 32], strides = [1, 1]} : vector<2x96xf32> to vector<2x32xf32>
    %34 = arith.addf %32, %33 : vector<2x32xf32>
    %35 = arith.negf %34 : vector<2x32xf32>
    %36 = math.exp %35 : vector<2x32xf32>
    %cst_23 = arith.constant 1.000000e+00 : f32
    %37 = vector.broadcast %cst_23 : f32 to vector<2x32xf32>
    %38 = arith.addf %37, %36 : vector<2x32xf32>
    %39 = arith.divf %37, %38 : vector<2x32xf32>
    %40 = vector.extract_strided_slice %18 {offsets = [0, 64], sizes = [2, 32], strides = [1, 1]} : vector<2x96xf32> to vector<2x32xf32>
    %41 = vector.extract_strided_slice %23 {offsets = [0, 64], sizes = [2, 32], strides = [1, 1]} : vector<2x96xf32> to vector<2x32xf32>
    %42 = arith.mulf %31, %41 : vector<2x32xf32>
    %43 = arith.addf %40, %42 : vector<2x32xf32>
    %44 = math.tanh %43 : vector<2x32xf32>
    %cst_24 = arith.constant 1.000000e+00 : f32
    %45 = vector.broadcast %cst_24 : f32 to vector<2x32xf32>
    %46 = arith.subf %45, %39 : vector<2x32xf32>
    %47 = arith.mulf %46, %44 : vector<2x32xf32>
    %48 = arith.mulf %39, %9 : vector<2x32xf32>
    %49 = arith.addf %47, %48 : vector<2x32xf32>
    %c0_25 = arith.constant 0 : index
    %c0_26 = arith.constant 0 : index
    %50 = vector.load %arg16[%c0_25, %c0_26] : memref<2x32xf32, #tpu.memory_space<vmem>>, vector<2x32xf32>
    tpu.vector_store %arg16[%c0_25, %c0_26], %49 {strides = array<i32>} : memref<2x32xf32, #tpu.memory_space<vmem>>, vector<2x32xf32>,
    %51 = vector.shape_cast %49 : vector<2x32xf32> to vector<2x1x32xf32>
    "tpu.trace_start"() <{level = 10 : i32, message = "bqh,bsh->bqs"}> : () -> ()
    %cst_27 = arith.constant dense<0.000000e+00> : vector<2x1x8xf32>
    %52 = tpu.matmul %51, %10, %cst_27 {dimension_numbers = #tpu.dot_dimension_numbers<[2], [2], [1], [1], [0, 0, 0, 1, 1, 1], [0], [0]>} : vector<2x1x32xf32>, vector<2x8x32xf32>, vector<2x1x8xf32> -> vector<2x1x8xf32>
    "tpu.trace_stop"() : () -> ()
    %53 = vector.shape_cast %13 : vector<2x8xi1> to vector<2x1x8xi1>
    %cst_28 = arith.constant -1.000000e+09 : f32
    %54 = vector.broadcast %cst_28 : f32 to vector<2x1x8xf32>
    %55 = arith.select %53, %54, %52 : vector<2x1x8xi1>, vector<2x1x8xf32>
    %cst_29 = arith.constant dense<0xFF800000> : vector<2x1xf32>
    %56 = vector.multi_reduction <maximumf>, %55, %cst_29 [2] : vector<2x1x8xf32> to vector<2x1xf32>
    %cst_30 = arith.constant 0xFF800000 : f32
    %57 = vector.broadcast %cst_30 : f32 to vector<2x1xf32>
    %58 = arith.maximumf %57, %56 : vector<2x1xf32>
    %59 = vector.shape_cast %58 : vector<2x1xf32> to vector<2x1x1xf32>
    %60 = vector.broadcast %59 : vector<2x1x1xf32> to vector<2x1x8xf32>
    %61 = arith.subf %55, %60 : vector<2x1x8xf32>
    %62 = math.exp %61 : vector<2x1x8xf32>
    %cst_31 = arith.constant dense<0.000000e+00> : vector<2x1xf32>
    %63 = vector.multi_reduction <add>, %62, %cst_31 [2] : vector<2x1x8xf32> to vector<2x1xf32>
    %64 = vector.shape_cast %63 : vector<2x1xf32> to vector<2x1x1xf32>
    %65 = vector.broadcast %64 : vector<2x1x1xf32> to vector<2x1x8xf32>
    %66 = arith.divf %62, %65 : vector<2x1x8xf32>
    "tpu.trace_start"() <{level = 10 : i32, message = "bqs,bsh->bqh"}> : () -> ()
    %cst_32 = arith.constant dense<0.000000e+00> : vector<2x1x32xf32>
    %67 = tpu.matmul %66, %10, %cst_32 {dimension_numbers = #tpu.dot_dimension_numbers<[2], [1], [1], [2], [0, 0, 0, 1, 1, 2], [0], [0]>} : vector<2x1x8xf32>, vector<2x8x32xf32>, vector<2x1x32xf32> -> vector<2x1x32xf32>
    "tpu.trace_stop"() : () -> ()
    %cst_33 = arith.constant dense<0.000000e+00> : vector<2x32xf32>
    %68 = vector.multi_reduction <add>, %67, %cst_33 [1] : vector<2x1x32xf32> to vector<2x32xf32>
    %69 = vector.shape_cast %11 : vector<2x8xi32> to vector<2x8x1xi32>
    %70 = tpu.iota {dimensions = array<i32: 2>} : vector<2x8x64xi32>
    %71 = vector.broadcast %69 : vector<2x8x1xi32> to vector<2x8x64xi32>
    %72 = arith.cmpi eq, %71, %70 : vector<2x8x64xi32>
    %73 = arith.extui %72 : vector<2x8x64xi1> to vector<2x8x64xi32>
    %74 = arith.sitofp %73 : vector<2x8x64xi32> to vector<2x8x64xf32>
    "tpu.trace_start"() <{level = 10 : i32, message = "bqs,bsv->bqv"}> : () -> ()
    %cst_34 = arith.constant dense<0.000000e+00> : vector<2x1x64xf32>
    %75 = tpu.matmul %66, %74, %cst_34 {dimension_numbers = #tpu.dot_dimension_numbers<[2], [1], [1], [2], [0, 0, 0, 1, 1, 2], [0], [0]>} : vector<2x1x8xf32>, vector<2x8x64xf32>, vector<2x1x64xf32> -> vector<2x1x64xf32>
    "tpu.trace_stop"() : () -> ()
    %cst_35 = arith.constant dense<0.000000e+00> : vector<2x64xf32>
    %76 = vector.multi_reduction <add>, %75, %cst_35 [1] : vector<2x1x64xf32> to vector<2x64xf32>
    %c0_36 = arith.constant 0 : index
    %c0_37 = arith.constant 0 : index
    %77 = vector.load %arg6[%c0_36, %c0_37] : memref<32x64xf32, #tpu.memory_space<vmem>>, vector<32x64xf32>
    %cst_38 = arith.constant dense<0.000000e+00> : vector<2x64xf32>
    %78 = tpu.matmul %49, %77, %cst_38 {dimension_numbers = #tpu.dot_dimension_numbers<[1], [0], [0], [1], [0, 0, 1, 1], [], []>} : vector<2x32xf32>, vector<32x64xf32>, vector<2x64xf32> -> vector<2x64xf32>
    %cst_39 = arith.constant dense<0xFF800000> : vector<2xf32>
    %79 = vector.multi_reduction <maximumf>, %78, %cst_39 [1] : vector<2x64xf32> to vector<2xf32>
    %cst_40 = arith.constant 0xFF800000 : f32
    %80 = vector.broadcast %cst_40 : f32 to vector<2xf32>
    %81 = arith.maximumf %80, %79 : vector<2xf32>
    %82 = vector.shape_cast %81 : vector<2xf32> to vector<2x1xf32>
    %83 = vector.broadcast %82 : vector<2x1xf32> to vector<2x64xf32>
    %84 = arith.subf %78, %83 : vector<2x64xf32>
    %85 = math.exp %84 : vector<2x64xf32>
    %cst_41 = arith.constant dense<0.000000e+00> : vector<2xf32>
    %86 = vector.multi_reduction <add>, %85, %cst_41 [1] : vector<2x64xf32> to vector<2xf32>
    %87 = vector.shape_cast %86 : vector<2xf32> to vector<2x1xf32>
    %88 = vector.broadcast %87 : vector<2x1xf32> to vector<2x64xf32>
    %89 = arith.divf %85, %88 : vector<2x64xf32>
    %c0_42 = arith.constant 0 : index
    %c0_43 = arith.constant 0 : index
    %90 = vector.load %arg11[%c0_42, %c0_43] : memref<1x32xf32, #tpu.memory_space<vmem>>, vector<1x32xf32>
    %91 = vector.broadcast %90 : vector<1x32xf32> to vector<2x32xf32>
    %92 = arith.mulf %8, %91 : vector<2x32xf32>
    %cst_44 = arith.constant dense<0.000000e+00> : vector<2xf32>
    %93 = vector.multi_reduction <add>, %92, %cst_44 [1] : vector<2x32xf32> to vector<2xf32>
    %94 = vector.shape_cast %93 : vector<2xf32> to vector<2x1xf32>
    %c0_45 = arith.constant 0 : index
    %c0_46 = arith.constant 0 : index
    %95 = vector.load %arg12[%c0_45, %c0_46] : memref<1x32xf32, #tpu.memory_space<vmem>>, vector<1x32xf32>
    %96 = vector.broadcast %95 : vector<1x32xf32> to vector<2x32xf32>
    %97 = arith.mulf %49, %96 : vector<2x32xf32>
    %cst_47 = arith.constant dense<0.000000e+00> : vector<2xf32>
    %98 = vector.multi_reduction <add>, %97, %cst_47 [1] : vector<2x32xf32> to vector<2xf32>
    %99 = vector.shape_cast %98 : vector<2xf32> to vector<2x1xf32>
    %100 = arith.addf %94, %99 : vector<2x1xf32>
    %c0_48 = arith.constant 0 : index
    %c0_49 = arith.constant 0 : index
    %101 = vector.load %arg13[%c0_48, %c0_49] : memref<1x32xf32, #tpu.memory_space<vmem>>, vector<1x32xf32>
    %102 = vector.broadcast %101 : vector<1x32xf32> to vector<2x32xf32>
    %103 = arith.mulf %68, %102 : vector<2x32xf32>
    %cst_50 = arith.constant dense<0.000000e+00> : vector<2xf32>
    %104 = vector.multi_reduction <add>, %103, %cst_50 [1] : vector<2x32xf32> to vector<2xf32>
    %105 = vector.shape_cast %104 : vector<2xf32> to vector<2x1xf32>
    %106 = arith.addf %100, %105 : vector<2x1xf32>
    %c0_51 = arith.constant 0 : index
    %c0_52 = arith.constant 0 : index
    %107 = vector.load %arg14[%c0_51, %c0_52] : memref<1x1xf32, #tpu.memory_space<vmem>>, vector<1x1xf32>
    %108 = vector.broadcast %107 : vector<1x1xf32> to vector<2x1xf32>
    %109 = arith.addf %106, %108 : vector<2x1xf32>
    %110 = arith.negf %109 : vector<2x1xf32>
    %111 = math.exp %110 : vector<2x1xf32>
    %cst_53 = arith.constant 1.000000e+00 : f32
    %112 = vector.broadcast %cst_53 : f32 to vector<2x1xf32>
    %113 = arith.addf %112, %111 : vector<2x1xf32>
    %114 = arith.divf %112, %113 : vector<2x1xf32>
    %115 = vector.broadcast %114 : vector<2x1xf32> to vector<2x64xf32>
    %116 = arith.mulf %115, %89 : vector<2x64xf32>
    %cst_54 = arith.constant 1.000000e+00 : f32
    %117 = vector.broadcast %cst_54 : f32 to vector<2x1xf32>
    %118 = arith.subf %117, %114 : vector<2x1xf32>
    %119 = vector.broadcast %118 : vector<2x1xf32> to vector<2x64xf32>
    %120 = arith.mulf %119, %76 : vector<2x64xf32>
    %121 = arith.addf %116, %120 : vector<2x64xf32>
    %122 = tpu.reduce_index %121 {axis = 1 : i32, kind = #tpu.reduction_kind<arg_max>} : vector<2x64xf32> -> vector<2xi32>
    %123 = tpu.iota {dimensions = array<i32: 1>} : vector<2x64xi32>
    %124 = vector.shape_cast %122 : vector<2xi32> to vector<2x1xi32>
    %125 = vector.broadcast %124 : vector<2x1xi32> to vector<2x64xi32>
    %126 = arith.cmpi eq, %123, %125 : vector<2x64xi32>
    %127 = arith.extui %126 : vector<2x64xi1> to vector<2x64xi32>
    %128 = arith.sitofp %127 : vector<2x64xi32> to vector<2x64xf32>
    %c0_55 = arith.constant 0 : index
    %c0_56 = arith.constant 0 : index
    %129 = vector.load %arg6[%c0_55, %c0_56] : memref<32x64xf32, #tpu.memory_space<vmem>>, vector<32x64xf32>
    %130 = tpu.transpose %129, [1, 0] : vector<32x64xf32> -> vector<64x32xf32>
    %cst_57 = arith.constant dense<0.000000e+00> : vector<2x32xf32>
    %131 = tpu.matmul %128, %130, %cst_57 {dimension_numbers = #tpu.dot_dimension_numbers<[1], [0], [0], [1], [0, 0, 1, 1], [], []>} : vector<2x64xf32>, vector<64x32xf32>, vector<2x32xf32> -> vector<2x32xf32>
    %c0_58 = arith.constant 0 : index
    %c0_59 = arith.constant 0 : index
    %132 = vector.load %arg17[%c0_58, %c0_59] : memref<2x32xf32, #tpu.memory_space<vmem>>, vector<2x32xf32>
    tpu.vector_store %arg17[%c0_58, %c0_59], %131 {strides = array<i32>} : memref<2x32xf32, #tpu.memory_space<vmem>>, vector<2x32xf32>,
    %133 = vector.shape_cast %121 : vector<2x64xf32> to vector<2x1x64xf32>
    %c0_60 = arith.constant 0 : index
    %c0_61 = arith.constant 0 : index
    %134 = arith.index_cast %arg1 : i32 to index
    %c0_62 = arith.constant 0 : index
    %135 = vector.load %arg15[%c0_60, %c0_61, %134, %c0_62] : memref<2x1x4x64xf32, #tpu.memory_space<vmem>>, vector<2x1x1x64xf32>
    %136 = vector.shape_cast %135 : vector<2x1x1x64xf32> to vector<2x1x64xf32>
    %137 = vector.shape_cast %133 : vector<2x1x64xf32> to vector<2x1x1x64xf32>
    tpu.vector_store %arg15[%c0_60, %c0_61, %134, %c0_62], %137 {strides = array<i32>} : memref<2x1x4x64xf32, #tpu.memory_space<vmem>>, vector<2x1x1x64xf32>,
    return
  }
  func.func @transform_0(%arg0: i32, %arg1: i32) -> (i32, i32) {
    %c0_i32 = arith.constant 0 : i32
    %c0_i32_0 = arith.constant 0 : i32
    %c0_i32_1 = arith.constant 0 : i32
    return %c0_i32, %c0_i32_0 : i32, i32
  }
  func.func @transform_1(%arg0: i32, %arg1: i32) -> (i32, i32, i32) {
    %c0_i32 = arith.constant 0 : i32
    %c0_i32_0 = arith.constant 0 : i32
    %c0_i32_1 = arith.constant 0 : i32
    return %arg0, %c0_i32, %c0_i32_0 : i32, i32, i32
  }
  func.func @transform_2(%arg0: i32, %arg1: i32) -> (i32, i32, i32) {
    %c0_i32 = arith.constant 0 : i32
    %c0_i32_0 = arith.constant 0 : i32
    %c0_i32_1 = arith.constant 0 : i32
    %c0_i32_2 = arith.constant 0 : i32
    return %c0_i32, %c0_i32_0, %c0_i32_1 : i32, i32, i32
  }
  func.func @transform_3(%arg0: i32, %arg1: i32) -> (i32, i32) {
    %c0_i32 = arith.constant 0 : i32
    %c0_i32_0 = arith.constant 0 : i32
    %c0_i32_1 = arith.constant 0 : i32
    return %c0_i32, %c0_i32_0 : i32, i32
  }
  func.func @transform_4(%arg0: i32, %arg1: i32) -> (i32, i32) {
    %c0_i32 = arith.constant 0 : i32
    %c0_i32_0 = arith.constant 0 : i32
    %c0_i32_1 = arith.constant 0 : i32
    return %c0_i32, %c0_i32_0 : i32, i32
  }
  func.func @transform_5(%arg0: i32, %arg1: i32) -> (i32, i32) {
    %c0_i32 = arith.constant 0 : i32
    %c0_i32_0 = arith.constant 0 : i32
    %c0_i32_1 = arith.constant 0 : i32
    return %c0_i32, %c0_i32_0 : i32, i32
  }
  func.func @transform_6(%arg0: i32, %arg1: i32) -> (i32, i32) {
    %c0_i32 = arith.constant 0 : i32
    %c0_i32_0 = arith.constant 0 : i32
    %c0_i32_1 = arith.constant 0 : i32
    return %c0_i32, %c0_i32_0 : i32, i32
  }
  func.func @transform_7(%arg0: i32, %arg1: i32) -> (i32, i32) {
    %c0_i32 = arith.constant 0 : i32
    %c0_i32_0 = arith.constant 0 : i32
    %c0_i32_1 = arith.constant 0 : i32
    return %c0_i32, %c0_i32_0 : i32, i32
  }
  func.func @transform_8(%arg0: i32, %arg1: i32) -> (i32, i32) {
    %c0_i32 = arith.constant 0 : i32
    %c0_i32_0 = arith.constant 0 : i32
    %c0_i32_1 = arith.constant 0 : i32
    return %c0_i32, %c0_i32_0 : i32, i32
  }
  func.func @transform_9(%arg0: i32, %arg1: i32) -> (i32, i32) {
    %c0_i32 = arith.constant 0 : i32
    %c0_i32_0 = arith.constant 0 : i32
    %c0_i32_1 = arith.constant 0 : i32
    return %c0_i32, %c0_i32_0 : i32, i32
  }
  func.func @transform_10(%arg0: i32, %arg1: i32) -> (i32, i32) {
    %c0_i32 = arith.constant 0 : i32
    %c0_i32_0 = arith.constant 0 : i32
    %c0_i32_1 = arith.constant 0 : i32
    return %c0_i32, %c0_i32_0 : i32, i32
  }
  func.func @transform_11(%arg0: i32, %arg1: i32) -> (i32, i32) {
    %c0_i32 = arith.constant 0 : i32
    %c0_i32_0 = arith.constant 0 : i32
    %c0_i32_1 = arith.constant 0 : i32
    return %c0_i32, %c0_i32_0 : i32, i32
  }
  func.func @transform_12(%arg0: i32, %arg1: i32) -> (i32, i32) {
    %c0_i32 = arith.constant 0 : i32
    %c0_i32_0 = arith.constant 0 : i32
    %c0_i32_1 = arith.constant 0 : i32
    return %c0_i32, %c0_i32_0 : i32, i32
  }
  func.func @transform_13(%arg0: i32, %arg1: i32) -> (i32, i32, i32, i32) {
    %c0_i32 = arith.constant 0 : i32
    %c0_i32_0 = arith.constant 0 : i32
    %c0_i32_1 = arith.constant 0 : i32
    %c0_i32_2 = arith.constant 0 : i32
    return %c0_i32, %arg0, %c0_i32_0, %c0_i32_1 : i32, i32, i32, i32
  }
}

</mosaic_0001>

<bundles_post_ra>
// kernel: tpu_custom_call.1
= control target key start
LH: loop header
LB: loop body
LE: loop exit
PB: predicated region body
PF: predicated region fallthrough
CT: control target
= control target key end

     0   :  { %s2065_s0 = inlined_call_operand.vmem [shape: s32[2,8], index: 0, kind: input, shape index: {}]   ;;  %s2066_s1 = inlined_call_operand.hbm [shape: f32[3,2,32], index: 1, kind: input, shape index: {}]   ;;  %s2067_s2 = inlined_call_operand.hbm [shape: f32[2,8,32], index: 2, kind: input, shape index: {}]   ;;  %s2068_s3 = inlined_call_operand.vmem [shape: f32[2,32], index: 3, kind: input, shape index: {}]   ;;  %s2069_s4 = inlined_call_operand.hbm [shape: f32[32,64], index: 4, kind: input, shape index: {}]   ;;  %s2070_s5 = inlined_call_operand.hbm [shape: f32[32,96], index: 5, kind: input, shape index: {}]   ;;  %s2071_s6 = inlined_call_operand.hbm [shape: f32[32,96], index: 6, kind: input, shape index: {}]   ;;  %s2072_s7 = inlined_call_operand.vmem [shape: f32[1,96], index: 7, kind: input, shape index: {}]   ;;  %s2073_s8 = inlined_call_operand.vmem [shape: f32[1,96], index: 8, kind: input, shape index: {}]   ;;  %s2074_s9 = inlined_call_operand.vmem [shape: f32[1,32], index: 9, kind: input, shape index: {}]   ;;  %s2075_s10 = inlined_call_operand.vmem [shape: f32[1,32], index: 10, kind: input, shape index: {}]   ;;  %s2076_s11 = inlined_call_operand.vmem [shape: f32[1,32], index: 11, kind: input, shape index: {}]   ;;  %s2077_s12 = inlined_call_operand.<no memory space> [shape: f32[1,1], index: 12, kind: input, shape index: {}]   ;;  %s2078_s13 = inlined_call_operand.hbm [shape: f32[2,3,4,64], index: 13, kind: output, shape index: {}]  }
   0x1   :  { %2083 = sst [smem:[#allocation21_spill]] %s2067_s2  ;;  %v18_v0 = vstv %s2077_s12 }
   0x2   :  { %2084 = sst [smem:[#allocation22_spill]] %s2069_s4  ;;  %19 = vst [vmem:[#allocation4] sm:$0x1] %v18_v0 }
   0x3   :  { %2085 = sst [smem:[#allocation23_spill]] %s2070_s5 }
   0x4   :  { %2086 = sst [smem:[#allocation24_spill]] %s2071_s6 }
   0x5   :  { %2087 = sst [smem:[#allocation25_spill]] %s2074_s9 }
   0x6   :  { %2088 = sst [smem:[#allocation26_spill]] %s2075_s10 }
   0x7   :  { %2089 = sst [smem:[#allocation27_spill]] %s2076_s11 }
   0x8   :  { %2090 = sst [smem:[#allocation28_spill]] %s2078_s13 }
   0x9   :  { %20 = vsyncpa [#allocation6], 0 }
   0xa   :  { %22 = vsyncpa [#allocation6 + $0x1], 0 }
   0xb   :  { %23 = vsyncpa [#allocation9], 0 }
   0xc   :  { %24 = vsyncpa [#allocation12], 0 }
   0xd   :  { %25 = vsyncpa [#allocation7], 0 }
   0xe   :  { %27 = vsyncpa [#allocation7 + $0x1], 0  ;;  %s1766_s27 = smov 0   ;;  %s1768_s28 = smov 0  }
   0xf   :  { %s1770_s29 = smov 0   ;;  %s1772_s30 = smov 0  }
  0x10   :  { %s1774_s14 = smov 0   ;;  %s1776_s15 = smov 0  }
  0x11   :  { %s1778_s12 = smov 0   ;;  %s1780_s16 = smov 0  }
  0x12 LB: > { %s2079_s17 = sadd.s32 4294967295, %s1677_s16   ;;  %p1217_p0 = scmp.ge.s32.totalorder %s1677_s16, 1  ;;  %s1677_s16 = sphi %s1780_s16, %s33_s16   ;;  %s1673_s12 = sphi %s1778_s12, %s2118_s12   ;;  %s1669_s15 = sphi %s1776_s15, %s2117_s15   ;;  %s1665_s14 = sphi %s1774_s14, %s2116_s14   ;;  %s1661_s30 = sphi %s1772_s30, %s2115_s30   ;;  %s1657_s29 = sphi %s1770_s29, %s2114_s29   ;;  %s1653_s28 = sphi %s1768_s28, %s2113_s28   ;;  %s1649_s27 = sphi %s1766_s27, %s2112_s27  }
  0x13   : > { %p1810_p1 = scmp.eq.s32.totalorder %s2079_s17, 0  ;;  %p354_p2 = scmp.lt.s32.totalorder %s1677_s16, 13 }
  0x14   : > { %s2092_s2 = sld [smem:[#allocation21_spill]]  ;;  %s1679_s23 = smov [#allocation8]  }
  0x15   : > { %p1818_p3 = pnand %p1217_p0, %p354_p2  ;;  %s370_s24 = sshll.u32 %s1679_s23, 4  ;;  %s371_s24 = int_to_ptr.vmem [resolvable:$true] %s370_s24 }
  0x16   : > { %s2095_s5 = sld [smem:[#allocation23_spill]]  ;;  %s1680_s20 = smov 128  }
  0x17   : > { %p1280_p4 = pneg %p1818_p3  ;;  %s1682_s23 = smov [#allocation11]  }
  0x18   : > { %s401_s13 = sshll.u32 %s1682_s23, 4  ;;  %s2096_s4 = sld [smem:[#allocation22_spill]]  ;;  %s402_s13 = int_to_ptr.vmem [resolvable:$true] %s401_s13 }
  0x19   : > { %p1826_p5 = pnand %p1280_p4, %p1810_p1  ;;  %s2097_s6 = sld [smem:[#allocation24_spill]] }
  0x1a   : > { %s368_s21 = sshll.u32 %s2092_s2, 4  ;;  %s1681_s2 = smov 8   ;;  %s369_s21 = int_to_ptr.hbm [resolvable:$true] %s368_s21 }
  0x1b   : > { %1283 = dma.hbm_to_vmem [thread:$0]  (!%p1826_p5), %s369_s21, 256, %s371_s24, [#allocation9], %s1680_s20, %s1680_s20, %s1681_s2  }
  0x1c   : > { %s399_s19 = sshll.u32 %s2095_s5, 4  ;;  %s1683_s24 = smov [#allocation10]   ;;  %s400_s19 = int_to_ptr.hbm [resolvable:$true] %s399_s19 }
  0x1d   : > { %1289 = dma.hbm_to_vmem [thread:$0]  (!%p1826_p5), %s400_s19, 512, %s402_s13, [#allocation12], %s1680_s20, %s1680_s20, %s1681_s2  }
  0x1e   : > { %s385_s10 = sshll.u32 %s2096_s4, 4  ;;  %s387_s23 = sshll.u32 %s1683_s24, 4  ;;  %s386_s10 = int_to_ptr.hbm [resolvable:$true] %s385_s10  ;;  %s388_s23 = int_to_ptr.vmem [resolvable:$true] %s387_s23 }
  0x1f   : > { %s413_s21 = sshll.u32 %s2097_s6, 4  ;;  %s1684_s9 = smov [#allocation13]   ;;  %s414_s21 = int_to_ptr.hbm [resolvable:$true] %s413_s21 }
  0x20   : > { %1286 = dma.hbm_to_vmem [thread:$0]  (!%p1826_p5), %s386_s10, 512, %s388_s23, [#allocation9], %s1680_s20, %s1680_s20, %s1681_s2  }
  0x21   : > { %s415_s11 = sshll.u32 %s1684_s9, 4  ;;  %s42_s13 = sadd.s32 1, %s1669_s15  ;;  %s416_s11 = int_to_ptr.vmem [resolvable:$true] %s415_s11 }
  0x22   : > { %1292 = dma.hbm_to_vmem [thread:$0]  (!%p1826_p5), %s414_s21, 512, %s416_s11, [#allocation12], %s1680_s20, %s1680_s20, %s1681_s2  }
  0x23   : > { %p43_p6 = scmp.ge.s32.totalorder %s42_s13, 4  ;;  %s45_s19 = sadd.s32 1, %s1673_s12 }
  0x24   : > { %s1216_s17 = sadd.s32 4294967294, %s1677_s16   ;;  %p80_p7 = scmp.ne.s32.totalorder %s1657_s29, %s1653_s28 }
  0x25   : > { %s2120_s13 = smov (%p43_p6, %s42_s13), 0  ;;  %s2122_s19 = smov (!%p43_p6, %s45_s19), %s1673_s12 }
  0x26   : > { %2098 = sst [smem:[#allocation19_spill]] %s2120_s13  ;;  %p81_p8 = scmp.eq.s32.totalorder %s1677_s16, 0 }
  0x27   : > { %p86_p9 = scmp.ne.s32.totalorder %s1653_s28, %s1649_s27  ;;  %p47_p10 = scmp.ge.s32.totalorder %s2122_s19, 3 }
  0x28   : > { %s2099_s10 = sadd.s32 4294967295, %s1677_s16   ;;  %s73_s2 = sadd.s32 1, %s1657_s29 }
  0x29   : > { %p341_p11 = scmp.eq.s32.totalorder %s2099_s10, 11  ;;  %p1863_p12 = por %p1810_p1, %p86_p9 }
  0x2a   : > { %s2124_s19 = smov (%p47_p10, %s2122_s19), 0  ;;  %p347_p0 = scmp.eq.s32.totalorder %s1216_s17, 11 }
  0x2b   : > { %2101 = sst [smem:[#allocation20_spill]] %s2124_s19  ;;  %p1872_p13 = por %p341_p11, %p80_p7 }
  0x2c   : > { %s70_s26 = ssub.s32 %s1673_s12, %s2124_s19  ;;  %p1881_p2 = por %p81_p8, %p80_p7 }
  0x2d   : > { %p71_p4 = scmp.eq.s32.totalorder %s70_s26, 0  ;;  %p1885_p5 = por %p347_p0, %p86_p9 }
  0x2e   : > { %s447_s23 = sand.u32 1, %s1657_s29   ;;  %s1224_s9 = sshll.u32 %s1673_s12, 1 }
  0x2f   : > { %s1892_s11 = scalar_select %p71_p4, %s1657_s29, %s73_s2  }
  0x30   : > { %p1305_p6 = scmp.lt.s32.totalorder %s1677_s16, 12  ;;  %s1223_s10 = sshll.u32 %s447_s23, 1 }
  0x31   : > { %s455_s5 = scalar_lea.hbm %s2066_s1, %s1224_s9  ;;  %s451_s19 = scalar_lea.vmem [#allocation5], %s1223_s10 }
  0x32   : > { %s457_s6 = sshll.u32 %s455_s5, 4  ;;  %s459_s13 = sshll.u32 %s451_s19, 4  ;;  %s458_s6 = int_to_ptr.hbm [resolvable:$true] %s457_s6  ;;  %s460_s13 = int_to_ptr.vmem [resolvable:$true] %s459_s13 }
  0x33   : > { %p1294_p7 = pnand %p1305_p6, %p1881_p2  ;;  %s448_s26 = scalar_lea.sflag [#allocation6], %s447_s23 }
  0x34   : > { %468 = sbr.rel (%p1818_p3) target bundleno = 1743 (0x6cf), region = 72  ;;  %s1903_s2 = sand.u32 (!%p1818_p3), 1, %s1653_s28  }
  0x35   : > { %1296 = dma.hbm_to_vmem [thread:$0]  (!%p1294_p7), %s458_s6, 32, %s460_s13, %s448_s26  }
  0x36   : > { %s1226_s4 = sshll.u32 (!%p1818_p3), %s1903_s2, 1  ;;  %s471_s9 = scalar_lea.sflag (!%p1818_p3), [#allocation6], %s1903_s2 }
  0x37   : > { %s474_s5 = scalar_lea.vmem (!%p1818_p3), [#allocation5], %s1226_s4 }
  0x39   : > { %1632 = dma.done.wait (%p1863_p12), %s471_s9, 32  }
  0x3a   : > { %1634 = vsyncadd (%p1863_p12), %s471_s9, 4294967264 }
  0x3b   : > { %1636 = dma.done.wait (%p1810_p1), [#allocation9], 768  }
  0x3c   : > { %1638 = vsyncadd (%p1810_p1), [#allocation9], 4294966528 }
  0x3d   : > { %1640 = dma.done.wait (%p1810_p1), [#allocation12], 1024  }
  0x3e   : > { %1642 = vsyncadd (%p1810_p1), [#allocation12], 4294966272  ;;  %s1231_s6 = sshll.u32 %s1903_s2, 3  ;;  %p538_p3 = scmp.eq.s32.totalorder %s1665_s14, 0 }
  0x3f   : > { %p539_p8 = scmp.eq.s32.totalorder %s1661_s30, 0  ;;  %s1922_s22 = scalar_lea.vmem [#allocation14], %s1231_s6 }
  0x41   : > { %p540_p9 = pnand %p539_p8, %p538_p3 }
  0x43   : > { %543 = sbr.rel (%p540_p9) target bundleno = 74 (0x4a), region = 96 }
  0x48   : > { %v544_v1 = vld [vmem:[%s2068_s3] sm:$0x3]  ;;  %vm545_vm0 = vcmask 254976  }
  0x49   : > { %546 = vst.msk [vmem:[#allocation2] sm:$0x3] %vm545_vm0, %v544_v1 }
  0x4a PF: > { %p1232_p10 = scmp.ne.s32.totalorder %s1661_s30, 0 }
  0x4c   : > { %549 = sbr.rel (%p1232_p10) target bundleno = 83 (0x53), region = 100 }
  0x51   : > { %v550_v2 = vld [vmem:[%s474_s5] sm:$0x3]  ;;  %vm551_vm1 = vcmask 254976  }
  0x52   : > { %552 = vst.msk [vmem:[#allocation3] sm:$0x3] %vm551_vm1, %v550_v2 }
  0x53 PF: > { %v562_v3 = vld [vmem:[#allocation11 + $0x18] sm:$0xff]  ;;  %v561_v5 = vld [vmem:[#allocation11 + $0x10] sm:$0xff]  ;;  %v560_v7 = vld [vmem:[#allocation11 + $0x8] sm:$0xff]  ;;  %vm567_vm2 = vcmask 261120   ;;  %s2082_s21 = smov 64   ;;  %s1686_s17 = smov 96   ;;  %v831_v62 = vlaneseq }
  0x54   : > { %v594_v4 = vld [vmem:[#allocation13 + $0x18] sm:$0xff]  ;;  %583 = vmatpush.msra.mxu0 %v562_v3  ;;  %v593_v6 = vld [vmem:[#allocation13 + $0x10] sm:$0xff]  ;;  %v592_v8 = vld [vmem:[#allocation13 + $0x8] sm:$0xff]  ;;  %s1687_s26 = smov 32   ;;  %v1688_v52 = vmov 0   ;;  %vm732_vm8 = vcmask 57344  }
  0x55   : > { %614 = vmatpush.msra.mxu1 %v594_v4  ;;  %v559_v9 = vld [vmem:[#allocation11] sm:$0xff]  ;;  %v555_v38 = vld [vmem:[#allocation8] sm:$0xff]  ;;  %v556_v48 = vld [vmem:[#allocation8 + $0x8] sm:$0xff]  ;;  %s2105_s13 = sld [smem:[#allocation26_spill]]  ;;  %v832_v63 = vshrl.u32 %v831_v62, 7  ;;  %vm668_vm10 = vcmask 254976  }
  0x56   : > { %584 = vmatpush.msra.mxu0 %v561_v5  ;;  %v591_v10 = vld [vmem:[#allocation13] sm:$0xff]  ;;  %1236 = vmatpush.xpose.msk.msra.mxu2 %vm567_vm2, %v555_v38  ;;  %s2106_s25 = sld [smem:[#allocation25_spill]]  ;;  %vm781_vm0 = vcmask 64512   ;;  %s1257_s4 = sshll.u32 %s1665_s14, 2 }
  0x57   : > { %615 = vmatpush.msra.mxu1 %v593_v6  ;;  %v554_v12 = vld [vmem:[#allocation2] sm:$0x3]  ;;  %823 = vmatpush.msra.mxu3 %v556_v48  ;;  %s2108_s5 = sld [smem:[#allocation28_spill]]  ;;  %s1078_s18 = scalar_lea.sflag [#allocation7], %s1903_s2 }
  0x58   : > { %585 = vmatpush.msra.mxu0 %v560_v7  ;;  %v1394_v13 = vld [vmem:[%s2073_s8] ss:$0 sm:$0xff]  ;;  %1390 = vset.pattern.permute.xlu0 %v832_v63 }
  0x59   : > { %v1928_v11 = vld [vmem:[#allocation3] sm:$0x3]  ;;  %616 = vmatpush.msra.mxu1 %v592_v8  ;;  %v1393_v16 = vld [vmem:[%s2072_s7] ss:$0 sm:$0xff]  ;;  %1389 = vset.pattern.permute.xlu2 %v832_v63 }
  0x5a   : > { %586 = vmatpush.msra.mxu0 %v559_v9  ;;  %800 = vmatpush.msrb.mxu2 %v555_v38  ;;  %v557_v51 = vld [vmem:[%s2065_s0] sm:$0x3] }
  0x5b   : > { %617 = vmatpush.msra.mxu1 %v591_v10  ;;  %1233 = vmatmul.msk.f32.vlgmr.msra.gmra.mxu0 %vm567_vm2, %v1928_v11  ;;  %vm558_vm7 = vcmp.eq.s32.totalorder %v557_v51, 0  ;;  %v1395_v61 = vld [vmem:[%s2105_s13] ss:$0 sm:$0xff]  ;;  %v830_v0 = vperm.slane %v557_v51, 0  ;;  %s1089_s13 = sshll.u32 %s1922_s22, 4  ;;  %s1090_s13 = int_to_ptr.vmem [resolvable:$true] %s1089_s13 }
  0x5c   : > { %1234 = vmatmul.msk.f32.vlgmr.msra.gmra.mxu1 %vm567_vm2, %v554_v12  ;;  %1238 = vmatpush.xpose.msk.msrb.mxu0 %vm567_vm2, %v556_v48  ;;  %v727_v53 = vsel %vm558_vm7, 1, %v1688_v52 }
  0x5d   : > { %v728_v54 = vrot.slane %v727_v53, 1  ;;  %s1088_s6 = scalar_lea.hbm %s2108_s5, %s1257_s4  ;;  %s1591_s14 = scalar_lea.hbm %s2108_s5, 24 }
  0x5e   : > { %s1091_s19 = sshll.u32 %s1088_s6, 4  ;;  %s1092_s19 = int_to_ptr.hbm [resolvable:$true] %s1091_s19 }
  0x5f   : > { %vm729_vm9 = vcmp.ne.s32.totalorder %v728_v54, 0 }
  0xd8   : > { %v588_v17 = vpop.f32.mrf.mxu0 }
  0xd9   : > { %v619_v14 = vpop.f32.mrf.mxu1  ;;  %v589_v18 = vadd.f32 %v1393_v16, %v588_v17  ;;  %v1396_v16 = vld [vmem:[%s2106_s25] ss:$0 sm:$0xff]  ;;  %s1585_s25 = sshra.s32 %s1092_s19, 4  ;;  %s1586_s25 = int_to_ptr.hbm [resolvable:$true] %s1585_s25 }
  0xda   : > { %v620_v15 = vadd.f32 %v1394_v13, %v619_v14  ;;  %v949_v17 = vmul.f32 %v1396_v16, %v1928_v11  ;;  %v1985_v11 = vld [vmem:[#allocation10] sm:$0xff]  ;;  %s1587_s23 = scalar_lea.hbm %s1586_s25, 8  ;;  %p1592_p0 = scmp.lt.s32.totalorder %s1586_s25, %s2108_s5 }
  0xdb   : > { %p1588_p1 = scmp.ne.s32.totalorder %s1586_s25, %s1587_s23  ;;  %p1593_p2 = scmp.lt.s32.totalorder %s1591_s14, %s1587_s23 }
  0xdc   : > { %643 = vrot.lane.b32.xlu0 %v620_v15, %s2082_s21  ;;  %v622_v19 = vadd.f32 %v620_v15, %v589_v18  ;;  %v837_v15 = vperm.slane %v557_v51, 1 }
  0xdd   : > { %p1589_p11 = pnand %p1588_p1, %p1872_p13  ;;  %p1594_p4 = por %p1593_p2, %p1592_p0 }
  0xde   : > { %v1235_v20 = vmul.f32 -1.442695, %v622_v19  ;;  %v950_v19 = vsel %vm668_vm10, %v949_v17, 0.0 }
  0xdf   : > { %p1590_p12 = pneg %p1589_p11 }
  0xe0   : > { %1399 = vpow2.f32 %v1235_v20 }
  0xe1   : > { %p1595_p6 = pnand %p1594_p4, %p1590_p12 }
  0xe6   : > { %v1400_v21 = vpop.eup %1399 }
  0xe7   : > { %v626_v22 = vadd.f32 1.0, %v1400_v21  ;;  %v1689_v21 = vmov 1.0  }
  0xe9   : > { %1401 = vrcp.f32 %v626_v22  ;;  %v638_v28 = vand.u32 2147483648, %v626_v22  ;;  %vm632_vm4 = vweird.f32 %v626_v22  ;;  %v636_v29 = vand.u32 2147483647, %v626_v22 }
  0xeb   : > { %v639_v31 = vor.u32 1.1754944e-38, %v638_v28  ;;  %vm637_vm6 = vcmp.eq.f32.partialorder %v636_v29, 8.507059e+37 }
  0xef   : > { %v1402_v23 = vpop.eup %1401 }
  0xf0   : > { %v628_v24 = vmul.f32 %v1402_v23, %v626_v22  ;;  %vm633_vm3 = vweird.f32 %v1402_v23  ;;  %v1977_v22 = vld [vmem:[#allocation10 + $0x18] sm:$0xff] }
  0xf1   : > { %vm634_vm5 = vmor %vm632_vm4, %vm633_vm3 }
  0xf2   : > { %v629_v25 = vsub.f32 1.0, %v628_v24  ;;  %v1982_v24 = vld [vmem:[#allocation10 + $0x8] sm:$0xff] }
  0xf4   : > { %v630_v26 = vmul.f32 %v1402_v23, %v629_v25 }
  0xf6   : > { %v631_v27 = vadd.f32 %v1402_v23, %v630_v26 }
  0xf8   : > { %v635_v30 = vsel %vm634_vm5, %v1402_v23, %v631_v27  ;;  %v1979_v23 = vld [vmem:[#allocation10 + $0x10] sm:$0xff] }
  0xf9   : > { %v640_v33 = vsel %vm637_vm6, %v639_v31, %v635_v30 }
  0xfa   : > { %v653_v40 = vsub.f32 1.0, %v640_v33 }
 0x14e   : > { %v644_v32 = vpop.permute.xlu0 %643 }
 0x14f   : > { %v646_v34 = vmul.f32 %v644_v32, %v640_v33 }
 0x151   : > { %648 = vrot.lane.b32.xlu0 %v646_v34, %s2082_s21 }
 0x1c3   : > { %v649_v35 = vpop.permute.xlu0 %648 }
 0x1c4   : > { %v651_v36 = vadd.f32 %v649_v35, %v589_v18  ;;  %v1973_v18 = vand.u32 127, %v831_v62 }
 0x1c6   : > { %1403 = vtanh.f32 %v651_v36 }
 0x1cc   : > { %v1404_v37 = vpop.eup %1403 }
 0x1cd   : > { %655 = vrot.lane.b32.xlu1 %v1404_v37, %s1686_s17 }
 0x1d5   : > { %659 = vrot.lane.b32.xlu1 %v554_v12, %s1687_s26 }
 0x23f   : > { %v656_v39 = vpop.permute.xlu1 %655 }
 0x240   : > { %v658_v42 = vmul.f32 %v656_v39, %v653_v40 }
 0x247   : > { %v660_v41 = vpop.permute.xlu1 %659 }
 0x248   : > { %v662_v43 = vmul.f32 %v660_v41, %v640_v33 }
 0x24a   : > { %v663_v44 = vadd.f32 %v662_v43, %v658_v42 }
 0x24c   : > { %v671_v45 = vperm.slane %v663_v44, 0  ;;  %v670_v46 = vrot.slane %v663_v44, 1 }
 0x24e   : > { %672 = vrot.lane.b32.xlu2 %v671_v45, %s1686_s17  ;;  %v699_v47 = vperm.slane %v670_v46, 0 }
 0x256   : > { %700 = vrot.lane.b32.xlu2 %v699_v47, %s1686_s17 }
 0x2a8   : > { %v673_v49 = vpop.permute.xlu2 %672 }
 0x2a9   : > { %1237 = vmatmul.msk.f32.vlgmr.msra.gmra.mxu2 %vm567_vm2, %v673_v49 }
 0x2aa   : > { %912 = vmatpush.msra.mxu2 %v1977_v22 }
 0x2ac   : > { %913 = vmatpush.msra.mxu2 %v1979_v23 }
 0x2ae   : > { %914 = vmatpush.msra.mxu2 %v1982_v24 }
 0x2b0   : > { %v701_v50 = vpop.permute.xlu2 %700  ;;  %915 = vmatpush.msra.mxu2 %v1985_v11 }
 0x2b1   : > { %1239 = vmatmul.msk.f32.vlgmr.msrb.gmra.mxu0 %vm567_vm2, %v701_v50 }
 0x32c   : > { %v696_v55 = vpop.f32.mrf.mxu2 }
 0x32d   : > { %v730_v56 = vsel %vm558_vm7, -1e+09, %v696_v55  ;;  %vm920_vm7 = vcmask 517120  }
 0x32e   : > { %v724_v57 = vpop.f32.mrf.mxu0  ;;  %v733_v58 = vsel %vm732_vm8, %v730_v56, -inf }
 0x32f   : > { %v731_v59 = vsel %vm729_vm9, -1e+09, %v724_v57  ;;  %734 = vmax.xlane.f32.xlu0 %v733_v58 }
 0x330   : > { %v736_v60 = vsel %vm732_vm8, %v731_v59, -inf }
 0x331   : > { %737 = vmax.xlane.f32.xlu1 %v736_v60 }
 0x343   : > { %665 = vrot.lane.b32.xlu0 %v663_v44, %s1686_s17 }
 0x34a   : > { %956 = vrot.lane.b32.xlu1 %v1395_v61, %s1687_s26  ;;  %s1073_s26 = scalar_lea.vmem %s1922_s22, %s1661_s30 [#allocation14] }
 0x34b   : > { %835 = vperm.xlu0 %1390, %v830_v0  }
 0x353   : > { %1391 = vset.pattern.permute.xlu0 %v1688_v52 }
 0x3a2   : > { %v735_v1 = vpop.xlane.xlu0 %734 }
 0x3a3   : > { %v739_v2 = vsub.f32 %v730_v56, %v735_v1 }
 0x3a4   : > { %v738_v3 = vpop.xlane.xlu1 %737 }
 0x3a5   : > { %v741_v4 = vmul.f32 1.442695, %v739_v2  ;;  %v740_v5 = vsub.f32 %v731_v59, %v738_v3 }
 0x3a7   : > { %1405 = vpow2.f32 %v741_v4  ;;  %v743_v6 = vmul.f32 1.442695, %v740_v5  ;;  %v1398_v4 = vld [vmem:[#allocation4] ss:$0 sm:$0xff] }
 0x3a9   : > { %1407 = vpow2.f32 %v743_v6 }
 0x3ad   : > { %v1406_v7 = vpop.eup %1405 }
 0x3ae   : > { %v745_v8 = vsel %vm732_vm8, %v1406_v7, 0.0 }
 0x3af   : > { %746 = vadd.xlane.f32.xlu2 %v745_v8  ;;  %v1960_v9 = vpop.eup %1407 }
 0x3b0   : > { %v748_v12 = vsel %vm732_vm8, %v1960_v9, 0.0  ;;  %vm977_vm8 = vcmask 1041409  }
 0x3b5   : > { %v1962_v10 = vpop.permute.xlu0 %665 }
 0x3b6   : > { %669 = vst.msk [vmem:[#allocation2] sm:$0x3] %vm668_vm10, %v1962_v10 }
 0x3b7   : > { %749 = vadd.xlane.f32.xlu2 %v748_v12 }
 0x3bc   : > { %v957_v13 = vpop.permute.xlu1 %956 }
 0x3bd   : > { %v959_v14 = vmul.f32 %v957_v13, %v663_v44  ;;  %v836_v20 = vpop.permute.xlu0 %835 }
 0x3be   : > { %vm846_vm11 = vcmp.eq.s32.totalorder %v836_v20, %v1973_v18 }
 0x3bf   : > { %961 = vrot.lane.b32.xlu1 %v959_v14, %s1686_s17  ;;  %1244 = vmatpush.msk.msra.mxu0 %vm846_vm11, %v1689_v21  ;;  %s2107_s17 = sld [smem:[#allocation27_spill]] }
 0x3c5   : > { %v1397_v53 = vld [vmem:[%s2107_s17] ss:$0 sm:$0xff] }
 0x3cf   : > { %842 = vperm.xlu2 %1389, %v837_v15  }
 0x3d7   : > { %1392 = vset.pattern.permute.xlu2 %v1688_v52 }
 0x3f8   : > { %951 = vadd.xlane.f32.xlu2 %v950_v19 }
 0x422   : > { %v747_v25 = vpop.xlane.xlu2 %746 }
 0x423   : > { %1409 = vrcp.f32 %v747_v25  ;;  %v762_v30 = vand.u32 2147483648, %v747_v25  ;;  %v760_v32 = vand.u32 2147483647, %v747_v25  ;;  %vm756_vm13 = vweird.f32 %v747_v25 }
 0x425   : > { %v763_v35 = vor.u32 1.1754944e-38, %v762_v30  ;;  %vm761_vm15 = vcmp.eq.f32.partialorder %v760_v32, 8.507059e+37 }
 0x429   : > { %v1410_v26 = vpop.eup %1409 }
 0x42a   : > { %v752_v27 = vmul.f32 %v1410_v26, %v747_v25  ;;  %v750_v28 = vpop.xlane.xlu2 %749  ;;  %vm757_vm12 = vweird.f32 %v1410_v26 }
 0x42b   : > { %1411 = vrcp.f32 %v750_v28  ;;  %vm758_vm14 = vmor %vm756_vm13, %vm757_vm12  ;;  %v777_v44 = vand.u32 2147483648, %v750_v28  ;;  %v775_v46 = vand.u32 2147483647, %v750_v28  ;;  %vm771_vm4 = vweird.f32 %v750_v28 }
 0x42c   : > { %v753_v29 = vsub.f32 1.0, %v752_v27  ;;  %vm1033_vm13 = vcmask 523264  }
 0x42d   : > { %v778_v48 = vor.u32 1.1754944e-38, %v777_v44  ;;  %vm776_vm6 = vcmp.eq.f32.partialorder %v775_v46, 8.507059e+37  ;;  %1251 = vmatpush.xpose.msk.msrb.mxu3 %vm1033_vm13, %v1977_v22 }
 0x42e   : > { %v754_v31 = vmul.f32 %v1410_v26, %v753_v29 }
 0x430   : > { %v755_v33 = vadd.f32 %v1410_v26, %v754_v31 }
 0x431   : > { %v1412_v34 = vpop.eup %1411  ;;  %v962_v36 = vpop.permute.xlu1 %961  ;;  %1252 = vmatpush.xpose.msk.msrb.mxu3 %vm1033_vm13, %v1979_v23 }
 0x432   : > { %v767_v37 = vmul.f32 %v1412_v34, %v750_v28  ;;  %v964_v38 = vsel %vm668_vm10, %v962_v36, 0.0  ;;  %v759_v39 = vsel %vm758_vm14, %v1410_v26, %v755_v33  ;;  %v843_v40 = vpop.permute.xlu2 %842  ;;  %vm772_vm3 = vweird.f32 %v1412_v34 }
 0x433   : > { %965 = vadd.xlane.f32.xlu1 %v964_v38  ;;  %v764_v41 = vsel %vm761_vm15, %v763_v35, %v759_v39  ;;  %vm847_vm1 = vcmp.eq.s32.totalorder %v843_v40, %v1973_v18  ;;  %vm773_vm5 = vmor %vm771_vm4, %vm772_vm3  ;;  %vm1074_vm3 = vcmask 516096  }
 0x434   : > { %v768_v42 = vsub.f32 1.0, %v767_v37  ;;  %v765_v43 = vmul.f32 %v1406_v7, %v764_v41  ;;  %1246 = vmatpush.msk.msrb.mxu1 %vm847_vm1, %v1689_v21 }
 0x435   : > { %1253 = vmatpush.xpose.msk.msrb.mxu3 %vm1033_vm13, %v1982_v24 }
 0x436   : > { %v769_v45 = vmul.f32 %v1412_v34, %v768_v42  ;;  %1240 = vmatmul.msk.f32.vlgmr.msrb.gmra.mxu2 %vm781_vm0, %v765_v43  ;;  %1245 = vmatmul.msk.f32.vlgmr.msra.gmra.mxu0 %vm781_vm0, %v765_v43 }
 0x438   : > { %v770_v47 = vadd.f32 %v1412_v34, %v769_v45 }
 0x439   : > { %1254 = vmatpush.xpose.msk.msrb.mxu3 %vm1033_vm13, %v1985_v11 }
 0x43a   : > { %v774_v49 = vsel %vm773_vm5, %v1412_v34, %v770_v47 }
 0x43b   : > { %v779_v50 = vsel %vm776_vm6, %v778_v48, %v774_v49  ;;  %v1690_v49 = vmov 0.0  }
 0x43c   : > { %v780_v51 = vmul.f32 %v1960_v9, %v779_v50 }
 0x43e   : > { %1241 = vmatmul.msk.f32.vlgmr.msra.gmra.mxu3 %vm781_vm0, %v780_v51  ;;  %1247 = vmatmul.msk.f32.vlgmr.msrb.gmra.mxu1 %vm781_vm0, %v780_v51 }
 0x43f   : > { %1248 = vmatmul.msk.f32.vlgmr.msra.gmra.mxu2 %vm567_vm2, %v1962_v10 }
 0x46b   : > { %v952_v62 = vpop.xlane.xlu2 %951 }
 0x4a6   : > { %v966_v63 = vpop.xlane.xlu1 %965 }
 0x4a7   : > { %v967_v2 = vadd.f32 %v966_v63, %v952_v62 }
 0x4b3   : > { %v869_v40 = vpop.f32.mrf.mxu0 }
 0x4b9   : > { %v802_v52 = vpop.f32.mrf.mxu2 }
 0x4ba   : > { %v972_v58 = vmul.f32 %v1397_v53, %v802_v52 }
 0x4bb   : > { %v889_v36 = vpop.f32.mrf.mxu1 }
 0x4bc   : > { %v1022_v38 = vrot.slane %v889_v36, 7 }
 0x4be   : > { %v1023_v11 = vsel %vm977_vm8, %v1022_v38, %v869_v40 }
 0x4c1   : > { %v825_v54 = vpop.f32.mrf.mxu3 }
 0x4c2   : > { %v973_v55 = vmul.f32 %v1397_v53, %v825_v54  ;;  %v917_v56 = vpop.f32.mrf.mxu2 }
 0x4c3   : > { %v921_v57 = vsel %vm920_vm7, %v917_v56, -inf }
 0x4c4   : > { %v976_v59 = vrot.slane %v973_v55, 7  ;;  %922 = vmax.xlane.f32.xlu2 %v921_v57 }
 0x4c6   : > { %v978_v60 = vsel %vm977_vm8, %v976_v59, %v972_v58 }
 0x4c7   : > { %v980_v61 = vsel %vm668_vm10, %v978_v60, 0.0 }
 0x4c8   : > { %981 = vadd.xlane.f32.xlu0 %v980_v61 }
 0x537   : > { %v923_v0 = vpop.xlane.xlu2 %922 }
 0x538   : > { %v924_v1 = vsub.f32 %v917_v56, %v923_v0 }
 0x53a   : > { %v925_v3 = vmul.f32 1.442695, %v924_v1 }
 0x53b   : > { %v982_v5 = vpop.xlane.xlu0 %981 }
 0x53c   : > { %1413 = vpow2.f32 %v925_v3  ;;  %v983_v6 = vadd.f32 %v982_v5, %v967_v2 }
 0x53e   : > { %v988_v7 = vadd.f32 %v1398_v4, %v983_v6 }
 0x540   : > { %v1249_v8 = vmul.f32 -1.442695, %v988_v7 }
 0x542   : > { %v1414_v9 = vpop.eup %1413  ;;  %1415 = vpow2.f32 %v1249_v8 }
 0x543   : > { %v927_v10 = vsel %vm920_vm7, %v1414_v9, 0.0 }
 0x544   : > { %928 = vadd.xlane.f32.xlu1 %v927_v10 }
 0x548   : > { %v1416_v12 = vpop.eup %1415 }
 0x549   : > { %v992_v13 = vadd.f32 1.0, %v1416_v12 }
 0x54b   : > { %1417 = vrcp.f32 %v992_v13  ;;  %v1004_v17 = vand.u32 2147483648, %v992_v13  ;;  %v1002_v20 = vand.u32 2147483647, %v992_v13  ;;  %vm998_vm9 = vweird.f32 %v992_v13 }
 0x54d   : > { %v1005_v25 = vor.u32 1.1754944e-38, %v1004_v17  ;;  %vm1003_vm12 = vcmp.eq.f32.partialorder %v1002_v20, 8.507059e+37 }
 0x551   : > { %v1418_v14 = vpop.eup %1417 }
 0x552   : > { %v994_v15 = vmul.f32 %v1418_v14, %v992_v13  ;;  %vm999_vm2 = vweird.f32 %v1418_v14 }
 0x553   : > { %vm1000_vm11 = vmor %vm998_vm9, %vm999_vm2 }
 0x554   : > { %v995_v16 = vsub.f32 1.0, %v994_v15 }
 0x556   : > { %v996_v19 = vmul.f32 %v1418_v14, %v995_v16 }
 0x558   : > { %v997_v21 = vadd.f32 %v1418_v14, %v996_v19 }
 0x55a   : > { %v1001_v26 = vsel %vm1000_vm11, %v1418_v14, %v997_v21 }
 0x55b   : > { %v1006_v27 = vsel %vm1003_vm12, %v1005_v25, %v1001_v26 }
 0x55c   : > { %1010 = vperm.xlu0 %1391, %v1006_v27   ;;  %v1014_v28 = vsub.f32 1.0, %v1006_v27 }
 0x55e   : > { %1017 = vperm.xlu2 %1392, %v1014_v28  }
 0x5b7   : > { %v929_v29 = vpop.xlane.xlu1 %928 }
 0x5b8   : > { %1419 = vrcp.f32 %v929_v29  ;;  %v941_v34 = vand.u32 2147483648, %v929_v29  ;;  %vm935_vm15 = vweird.f32 %v929_v29  ;;  %v939_v22 = vand.u32 2147483647, %v929_v29  ;;  %v1018_v39 = vpop.permute.xlu2 %1017 }
 0x5b9   : > { %v1025_v43 = vmul.f32 %v1023_v11, %v1018_v39 }
 0x5ba   : > { %v942_v37 = vor.u32 1.1754944e-38, %v941_v34  ;;  %vm940_vm1 = vcmp.eq.f32.partialorder %v939_v22, 8.507059e+37 }
 0x5be   : > { %v1420_v30 = vpop.eup %1419 }
 0x5bf   : > { %v931_v31 = vmul.f32 %v1420_v30, %v929_v29  ;;  %vm936_vm14 = vweird.f32 %v1420_v30 }
 0x5c0   : > { %vm937_vm0 = vmor %vm935_vm15, %vm936_vm14 }
 0x5c1   : > { %v932_v32 = vsub.f32 1.0, %v931_v31 }
 0x5c3   : > { %v933_v33 = vmul.f32 %v1420_v30, %v932_v32 }
 0x5c5   : > { %v934_v35 = vadd.f32 %v1420_v30, %v933_v33 }
 0x5c7   : > { %v938_v23 = vsel %vm937_vm0, %v1420_v30, %v934_v35 }
 0x5c8   : > { %v943_v24 = vsel %vm940_vm1, %v942_v37, %v938_v23 }
 0x5c9   : > { %v944_v41 = vmul.f32 %v1414_v9, %v943_v24 }
 0x5ce   : > { %v1011_v42 = vpop.permute.xlu0 %1010 }
 0x5cf   : > { %v1013_v44 = vmul.f32 %v1011_v42, %v944_v41 }
 0x5d1   : > { %v1026_v45 = vadd.f32 %v1025_v43, %v1013_v44 }
 0x5d3   : > { %v1071_v46 = vrot.slane %v1026_v45, 1  ;;  %1075 = vst.msk [vmem:[%s1073_s26] sm:$0x1] %vm1074_vm3, %v1026_v45  ;;  %v1027_v47 = vsel %vm920_vm7, %v1026_v45, -inf }
 0x5d4   : > { %1028 = vmax.index.xlane.f32.xlu1 %v1027_v47 }
 0x5d5   : > { %1076 = vst.msk [vmem:[%s1073_s26 + $0x4] sm:$0x1] %vm1074_vm3, %v1071_v46 }
 0x647   : > { %v1029_v48 = vpop.xlane.xlu1 %1028 }
 0x648   : > { %vm1030_vm4 = vcmp.eq.s32.totalorder %v1973_v18, %v1029_v48 }
 0x649   : > { %v1250_v50 = vsel %vm1030_vm4, 1.0, %v1690_v49 }
 0x64a   : > { %1255 = vmatmul.msk.f32.vlgmr.msrb.gmra.mxu3 %vm1033_vm13, %v1250_v50 }
 0x64b   : > { %1598 = shalt.err (!%p1595_p6)
}
 0x64c   : > { %s1691_s2 = smov 192   ;;  %s1692_s22 = smov 4  }
 0x64d   : > { %s2109_s4 = smov 64  }
 0x64e   : > { %1278 = dma.vmem_to_hbm [thread:$0]  (%p1872_p13), %s1090_s13, 128, %s1092_s19, %s1078_s18, %s2109_s4, %s1691_s2, %s1692_s22  }
 0x6cd   : > { %v1066_v18 = vpop.f32.mrf.mxu3 }
 0x6ce   : > { %1069 = vst.msk [vmem:[#allocation3] sm:$0x3] %vm668_vm10, %v1066_v18 }
 0x6cf PF: > { %p1310_p7 = scmp.ge.s32.totalorder %s1677_s16, 2  ;;  %s1106_s21 = sand.u32 1, %s1649_s27  }
 0x6d0   : > { %s1107_s9 = scalar_lea.sflag [#allocation7], %s1106_s21 }
 0x6d1   : > { %p1298_p3 = pnand %p1310_p7, %p1885_p5 }
 0x6d3   : > { %p1299_p8 = pneg %p1298_p3 }
 0x6d5   : > { %1644 = dma.done.wait (%p1299_p8), %s1107_s9, 128  }
 0x6d6   : > { %1646 = vsyncadd (%p1299_p8), %s1107_s9, 4294967168  ;;  %s33_s16 = sadd.s32 1, %s1677_s16   ;;  %s2110_s20 = sld [smem:[#allocation19_spill]] }
 0x6d7   : > { %p30_p9 = scmp.ge.s32.totalorder %s33_s16, 14   ;;  %s2111_s6 = sld [smem:[#allocation20_spill]] }
 0x6d8   : > { %s2112_s27 = smov %s1653_s28  ;;  %s2113_s28 = smov %s1657_s29 }
 0x6d9   : > { %s2114_s29 = smov %s1892_s11  ;;  %s2115_s30 = smov %s1669_s15 }
 0x6da   : > { %s2116_s14 = smov %s1673_s12  ;;  %32 = sbr.rel (!%p30_p9) target bundleno = 18 (0x12), region = 142 }
 0x6dc   : > { %s2117_s15 = smov %s2110_s20 }
 0x6dd   : > { %s2118_s12 = smov %s2111_s6 }
 0x6df   :  { %1113 = vsyncpa [#allocation6], 1 }
 0x6e0   :  { %1115 = vsyncpa [#allocation6 + $0x1], 1 }
 0x6e1   :  { %1116 = vsyncpa [#allocation9], 1 }
 0x6e2   :  { %1117 = vsyncpa [#allocation12], 1 }
 0x6e3   :  { %1118 = vsyncpa [#allocation7], 1 }
 0x6e4   :  { %1120 = vsyncpa [#allocation7 + $0x1], 1 }

</bundles_post_ra>
